<compile_context>
chip_gen: v7x
topology: tpu7x:2x2x1
jax: 0.10.0
libtpu: 0.0.40
codegen_flags: <defaults>
</compile_context>

<pallas_src>
import numpy as np
import jax
import jax.numpy as jnp
from jax.experimental import pallas as pl
from jax.experimental.pallas import tpu as pltpu


# ----------------------------------------------------------------------------
# Deterministic "parameter" construction (window, DFT basis, mel filterbank).
# ----------------------------------------------------------------------------
def _round_up(x, m):
    return ((x + m - 1) // m) * m


def _hann_window_padded(win_size, n_fft):
    # periodic hann (like torch.hann_window), zero-padded to n_fft (centered),
    # mirroring torch.stft's handling of win_length < n_fft.
    n = np.arange(win_size, dtype=np.float64)
    w = 0.5 - 0.5 * np.cos(2.0 * np.pi * n / win_size)
    left = (n_fft - win_size) // 2
    out = np.zeros(n_fft, dtype=np.float64)
    out[left:left + win_size] = w
    return out


def _mel_filterbank(sr, n_fft, n_mels, fmin, fmax):
    # HTK-style triangular mel filterbank, (n_mels, n_freq).
    n_freq = n_fft // 2 + 1

    def hz_to_mel(f):
        return 2595.0 * np.log10(1.0 + np.asarray(f, dtype=np.float64) / 700.0)

    def mel_to_hz(m):
        return 700.0 * (10.0 ** (np.asarray(m, dtype=np.float64) / 2595.0) - 1.0)

    mel_pts = np.linspace(hz_to_mel(fmin), hz_to_mel(fmax), n_mels + 2)
    hz_pts = mel_to_hz(mel_pts)
    fftfreqs = np.linspace(0.0, sr / 2.0, n_freq)
    fdiff = np.diff(hz_pts)
    ramps = hz_pts[:, None] - fftfreqs[None, :]
    lower = -ramps[:-2] / fdiff[:-1, None]
    upper = ramps[2:] / fdiff[1:, None]
    fb = np.maximum(0.0, np.minimum(lower, upper))
    return fb  # (n_mels, n_freq)


def _raw_dft_mel(sr, n_fft, win_size, n_mels, fmin, fmax):
    """Unpadded f32 constants (used by the pure-JAX reference)."""
    n_freq = n_fft // 2 + 1
    window = _hann_window_padded(win_size, n_fft)                 # (n_fft,)
    n = np.arange(n_fft, dtype=np.float64)[:, None]
    k = np.arange(n_freq, dtype=np.float64)[None, :]
    ang = 2.0 * np.pi * n * k / n_fft
    # Window is folded into the DFT basis: (x*w) @ C == x @ (w[:,None]*C).
    cos_b = (window[:, None] * np.cos(ang)).astype(np.float32)    # (n_fft, n_freq)
    sin_b = (-(window[:, None] * np.sin(ang))).astype(np.float32)
    fb_t = _mel_filterbank(sr, n_fft, n_mels, fmin, fmax).T.astype(np.float32)
    return cos_b, sin_b, fb_t                                     # fb_t: (n_freq, n_mels)


def _fused_dft_mel(sr, n_fft, win_size, n_mels, fmin, fmax):
    """Lane-padded, fused constants for the kernel.

    Returns:
      basis:  (n_fft, 2*n_freq_pad) f32 -- [cos | sin], each zero-padded on the
              freq axis to a multiple of 128.
      fb_pad: (n_freq_pad, n_mels_pad) f32 -- mel filterbank^T, zero-padded.
    """
    cos_b, sin_b, fb_t = _raw_dft_mel(sr, n_fft, win_size, n_mels, fmin, fmax)
    n_freq = cos_b.shape[1]
    n_freq_pad = _round_up(n_freq, 128)
    n_mels_pad = _round_up(n_mels, 128)

    basis = np.zeros((n_fft, 2 * n_freq_pad), dtype=np.float32)
    basis[:, :n_freq] = cos_b
    basis[:, n_freq_pad:n_freq_pad + n_freq] = sin_b

    fb_pad = np.zeros((n_freq_pad, n_mels_pad), dtype=np.float32)
    fb_pad[:n_freq, :n_mels] = fb_t
    return basis, fb_pad, n_freq_pad, n_mels_pad


def _frame_signal(x, n_fft, hop_size):
    # x: (B, T) -> reflect pad then frame to (B*n_frames, n_fft); keeps dtype.
    pad = (n_fft - hop_size) // 2
    xp = jnp.pad(x, ((0, 0), (pad, pad)), mode="reflect")
    B, Tp = xp.shape
    n_frames = (Tp - n_fft) // hop_size + 1
    idx = np.arange(n_frames)[:, None] * hop_size + np.arange(n_fft)[None, :]
    frames = xp[:, idx].reshape(B * n_frames, n_fft)
    return frames, n_frames


# ----------------------------------------------------------------------------
# Pallas kernel: per frame tile, one fused DFT matmul -> magnitude -> mel
# matmul -> log-clamp for both pred & target; |diff| reduced to a per-tile
# partial sum written to this step's own (1,1) SMEM output block.
# ----------------------------------------------------------------------------
def _make_mel_mae_kernel(n_freq_pad):
    def kernel(fp_ref, ft_ref, basis_ref, fb_ref, out_ref):
        basis = basis_ref[...]   # (n_fft, 2*n_freq_pad) bf16
        fb = fb_ref[...]         # (n_freq_pad, n_mels_pad) bf16

        def logmel(frames):
            ri = jnp.dot(frames, basis, preferred_element_type=jnp.float32)
            re = ri[:, :n_freq_pad]            # static, 128-aligned split
            im = ri[:, n_freq_pad:]
            mag = jnp.sqrt(re * re + im * im + 1e-9)
            mel = jnp.dot(mag.astype(jnp.bfloat16), fb,
                          preferred_element_type=jnp.float32)
            return jnp.log(jnp.maximum(mel, 1e-5))

        diff = jnp.abs(logmel(ft_ref[...]) - logmel(fp_ref[...]))
        out_ref[0, 0] = jnp.sum(diff)

    return kernel


def mel_mae_loss(pred, target, *, sr=24000, n_fft=1024, win_size=900,
                 hop_size=150, n_mels=128, fmin=20.0, fmax=12000.0,
                 tile_m=256):
    """pred/target: (B, 1, T) float32. Returns {'G/mel_mae_loss': scalar}."""
    basis_np, fb_np, n_freq_pad, n_mels_pad = _fused_dft_mel(
        sr, n_fft, win_size, n_mels, fmin, fmax)
    basis = jnp.asarray(basis_np).astype(jnp.bfloat16)
    fb = jnp.asarray(fb_np).astype(jnp.bfloat16)

    # squeeze(1); cast to bf16 BEFORE framing so the frame gather writes half
    # the bytes to HBM.
    p = pred[:, 0, :].astype(jnp.bfloat16)
    t = target[:, 0, :].astype(jnp.bfloat16)
    frames_p, _ = _frame_signal(p, n_fft, hop_size)
    frames_t, _ = _frame_signal(t, n_fft, hop_size)

    nf = frames_p.shape[0]
    # Large tiles keep the MXU rows full; cap to the (8-rounded) frame count so
    # tiny inputs don't over-pad.
    tile = min(tile_m, _round_up(nf, 8))
    nf_pad = _round_up(nf, tile)
    if nf_pad != nf:
        # zero frames give identical log-mel for pred & target -> contribute 0.
        z = jnp.zeros((nf_pad - nf, n_fft), frames_p.dtype)
        frames_p = jnp.concatenate([frames_p, z], axis=0)
        frames_t = jnp.concatenate([frames_t, z], axis=0)
    n_tiles = nf_pad // tile

    partial = pl.pallas_call(
        _make_mel_mae_kernel(n_freq_pad),
        out_shape=jax.ShapeDtypeStruct((n_tiles, 1), jnp.float32),
        grid=(n_tiles,),
        in_specs=[
            pl.BlockSpec((tile, n_fft), lambda i: (i, 0)),
            pl.BlockSpec((tile, n_fft), lambda i: (i, 0)),
            pl.BlockSpec((n_fft, 2 * n_freq_pad), lambda i: (0, 0)),
            pl.BlockSpec((n_freq_pad, n_mels_pad), lambda i: (0, 0)),
        ],
        # Per-grid-step output block => safe to mark the grid axis "parallel".
        out_specs=pl.BlockSpec((1, 1), lambda i: (i, 0),
                               memory_space=pltpu.SMEM),
        compiler_params=pltpu.CompilerParams(
            dimension_semantics=("parallel",),
            vmem_limit_bytes=48 * 1024 * 1024),
    )(frames_p, frames_t, basis, fb)

    denom = float(nf * n_mels)   # mean over real (unpadded) mel elements
    return {"G/mel_mae_loss": jnp.sum(partial) / denom}


# ----------------------------------------------------------------------------
# Pure-JAX reference (f32, HIGHEST precision) for a sanity check.
# ----------------------------------------------------------------------------
def mel_mae_ref(pred, target, *, sr, n_fft, win_size, hop_size, n_mels,
                fmin, fmax):
    cos_b, sin_b, fb_t = _raw_dft_mel(sr, n_fft, win_size, n_mels, fmin, fmax)
    cos_b, sin_b, fb_t = map(jnp.asarray, (cos_b, sin_b, fb_t))

    def logmel(x):
        frames, _ = _frame_signal(x[:, 0, :].astype(jnp.float32), n_fft,
                                  hop_size)
        hi = jax.lax.Precision.HIGHEST
        re = jnp.dot(frames, cos_b, precision=hi)
        im = jnp.dot(frames, sin_b, precision=hi)
        mag = jnp.sqrt(re * re + im * im + 1e-9)
        mel = jnp.dot(mag, fb_t, precision=hi)
        return jnp.log(jnp.maximum(mel, 1e-5))

    return jnp.mean(jnp.abs(logmel(target) - logmel(pred)))


if __name__ == "__main__":
    cfg = dict(sr=24000, n_fft=256, win_size=200, hop_size=64,
               n_mels=32, fmin=20.0, fmax=8000.0)
    B, T = 2, 1024
    key = jax.random.PRNGKey(0)
    kp, kt = jax.random.split(key)
    pred = jax.random.normal(kp, (B, 1, T), dtype=jnp.float32)
    target = jax.random.normal(kt, (B, 1, T), dtype=jnp.float32)

    losses = mel_mae_loss(pred, target, **cfg)
    val = jax.block_until_ready(losses["G/mel_mae_loss"])

    ref = jax.block_until_ready(mel_mae_ref(pred, target, **cfg))
    np.testing.assert_allclose(np.asarray(val), np.asarray(ref),
                               rtol=2e-2, atol=2e-2)
    print("KERNEL_OK")
</pallas_src>

<mosaic_0001>
module attributes {stable_mosaic.version = 11 : i64} {
  func.func @kernel(%arg0: i32, %arg1: memref<32x256xbf16, #tpu.memory_space<vmem>>, %arg2: memref<32x256xbf16, #tpu.memory_space<vmem>>, %arg3: memref<256x512xbf16, #tpu.memory_space<vmem>>, %arg4: memref<256x128xbf16, #tpu.memory_space<vmem>>, %arg5: memref<1x1xf32, #tpu.memory_space<smem>>) attributes {dimension_semantics = [#tpu.dimension_semantics<parallel>], iteration_bounds = array<i64: 1>, scalar_prefetch = 0 : i64, scratch_operands = 0 : i64, tpu.core_type = #tpu.core_type<tc>, window_params = [{transform_indices = @transform_0, window_bounds = array<i64: 32, 256>}, {transform_indices = @transform_1, window_bounds = array<i64: 32, 256>}, {pipeline_mode = #tpu.pipeline_mode<synchronous>, transform_indices = @transform_2, window_bounds = array<i64: 256, 512>}, {pipeline_mode = #tpu.pipeline_mode<synchronous>, transform_indices = @transform_3, window_bounds = array<i64: 256, 128>}, {transform_indices = @transform_4, window_bounds = array<i64: 1, 1>}]} {
    %c0 = arith.constant 0 : index
    %c0_0 = arith.constant 0 : index
    %0 = vector.load %arg3[%c0, %c0_0] : memref<256x512xbf16, #tpu.memory_space<vmem>>, vector<256x512xbf16>
    %c0_1 = arith.constant 0 : index
    %c0_2 = arith.constant 0 : index
    %1 = vector.load %arg4[%c0_1, %c0_2] : memref<256x128xbf16, #tpu.memory_space<vmem>>, vector<256x128xbf16>
    %c0_3 = arith.constant 0 : index
    %c0_4 = arith.constant 0 : index
    %2 = vector.load %arg2[%c0_3, %c0_4] : memref<32x256xbf16, #tpu.memory_space<vmem>>, vector<32x256xbf16>
    %cst = arith.constant dense<0.000000e+00> : vector<32x512xf32>
    %3 = tpu.matmul %2, %0, %cst {dimension_numbers = #tpu.dot_dimension_numbers<[1], [0], [0], [1], [0, 0, 1, 1], [], []>} : vector<32x256xbf16>, vector<256x512xbf16>, vector<32x512xf32> -> vector<32x512xf32>
    %4 = vector.extract_strided_slice %3 {offsets = [0, 0], sizes = [32, 256], strides = [1, 1]} : vector<32x512xf32> to vector<32x256xf32>
    %5 = vector.extract_strided_slice %3 {offsets = [0, 256], sizes = [32, 256], strides = [1, 1]} : vector<32x512xf32> to vector<32x256xf32>
    %6 = arith.mulf %4, %4 : vector<32x256xf32>
    %7 = arith.mulf %5, %5 : vector<32x256xf32>
    %8 = arith.addf %6, %7 : vector<32x256xf32>
    %cst_5 = arith.constant 9.99999971E-10 : f32
    %9 = vector.broadcast %cst_5 : f32 to vector<32x256xf32>
    %10 = arith.addf %8, %9 : vector<32x256xf32>
    %11 = math.sqrt %10 : vector<32x256xf32>
    %12 = arith.truncf %11 : vector<32x256xf32> to vector<32x256xbf16>
    %cst_6 = arith.constant dense<0.000000e+00> : vector<32x128xf32>
    %13 = tpu.matmul %12, %1, %cst_6 {dimension_numbers = #tpu.dot_dimension_numbers<[1], [0], [0], [1], [0, 0, 1, 1], [], []>} : vector<32x256xbf16>, vector<256x128xbf16>, vector<32x128xf32> -> vector<32x128xf32>
    %cst_7 = arith.constant 9.99999974E-6 : f32
    %14 = vector.broadcast %cst_7 : f32 to vector<32x128xf32>
    %15 = arith.maximumf %13, %14 : vector<32x128xf32>
    %16 = math.log %15 : vector<32x128xf32>
    %c0_8 = arith.constant 0 : index
    %c0_9 = arith.constant 0 : index
    %17 = vector.load %arg1[%c0_8, %c0_9] : memref<32x256xbf16, #tpu.memory_space<vmem>>, vector<32x256xbf16>
    %cst_10 = arith.constant dense<0.000000e+00> : vector<32x512xf32>
    %18 = tpu.matmul %17, %0, %cst_10 {dimension_numbers = #tpu.dot_dimension_numbers<[1], [0], [0], [1], [0, 0, 1, 1], [], []>} : vector<32x256xbf16>, vector<256x512xbf16>, vector<32x512xf32> -> vector<32x512xf32>
    %19 = vector.extract_strided_slice %18 {offsets = [0, 0], sizes = [32, 256], strides = [1, 1]} : vector<32x512xf32> to vector<32x256xf32>
    %20 = vector.extract_strided_slice %18 {offsets = [0, 256], sizes = [32, 256], strides = [1, 1]} : vector<32x512xf32> to vector<32x256xf32>
    %21 = arith.mulf %19, %19 : vector<32x256xf32>
    %22 = arith.mulf %20, %20 : vector<32x256xf32>
    %23 = arith.addf %21, %22 : vector<32x256xf32>
    %cst_11 = arith.constant 9.99999971E-10 : f32
    %24 = vector.broadcast %cst_11 : f32 to vector<32x256xf32>
    %25 = arith.addf %23, %24 : vector<32x256xf32>
    %26 = math.sqrt %25 : vector<32x256xf32>
    %27 = arith.truncf %26 : vector<32x256xf32> to vector<32x256xbf16>
    %cst_12 = arith.constant dense<0.000000e+00> : vector<32x128xf32>
    %28 = tpu.matmul %27, %1, %cst_12 {dimension_numbers = #tpu.dot_dimension_numbers<[1], [0], [0], [1], [0, 0, 1, 1], [], []>} : vector<32x256xbf16>, vector<256x128xbf16>, vector<32x128xf32> -> vector<32x128xf32>
    %cst_13 = arith.constant 9.99999974E-6 : f32
    %29 = vector.broadcast %cst_13 : f32 to vector<32x128xf32>
    %30 = arith.maximumf %28, %29 : vector<32x128xf32>
    %31 = math.log %30 : vector<32x128xf32>
    %32 = arith.subf %16, %31 : vector<32x128xf32>
    %33 = math.absf %32 : vector<32x128xf32>
    %34 = vector.shape_cast %33 : vector<32x128xf32> to vector<1x32x128xf32>
    %cst_14 = arith.constant dense<0.000000e+00> : vector<1xf32>
    %35 = vector.multi_reduction <add>, %34, %cst_14 [1, 2] : vector<1x32x128xf32> to vector<1xf32>
    %36 = vector.shape_cast %35 : vector<1xf32> to vector<1x1x1xf32>
    %37 = vector.extract %36[0, 0, 0] : f32 from vector<1x1x1xf32>
    %c0_15 = arith.constant 0 : index
    %c0_16 = arith.constant 0 : index
    %38 = memref.load %arg5[%c0_15, %c0_16] : memref<1x1xf32, #tpu.memory_space<smem>>
    memref.store %37, %arg5[%c0_15, %c0_16] : memref<1x1xf32, #tpu.memory_space<smem>>
    return
  }
  func.func @transform_0(%arg0: i32) -> (i32, i32) {
    %c0_i32 = arith.constant 0 : i32
    %c0_i32_0 = arith.constant 0 : i32
    return %arg0, %c0_i32 : i32, i32
  }
  func.func @transform_1(%arg0: i32) -> (i32, i32) {
    %c0_i32 = arith.constant 0 : i32
    %c0_i32_0 = arith.constant 0 : i32
    return %arg0, %c0_i32 : i32, i32
  }
  func.func @transform_2(%arg0: i32) -> (i32, i32) {
    %c0_i32 = arith.constant 0 : i32
    %c0_i32_0 = arith.constant 0 : i32
    %c0_i32_1 = arith.constant 0 : i32
    return %c0_i32, %c0_i32_0 : i32, i32
  }
  func.func @transform_3(%arg0: i32) -> (i32, i32) {
    %c0_i32 = arith.constant 0 : i32
    %c0_i32_0 = arith.constant 0 : i32
    %c0_i32_1 = arith.constant 0 : i32
    return %c0_i32, %c0_i32_0 : i32, i32
  }
  func.func @transform_4(%arg0: i32) -> (i32, i32) {
    %c0_i32 = arith.constant 0 : i32
    %c0_i32_0 = arith.constant 0 : i32
    return %arg0, %c0_i32 : i32, i32
  }
}

</mosaic_0001>

<bundles_post_ra>
// kernel: tpu_custom_call.1
= control target key start
LH: loop header
LB: loop body
LE: loop exit
PB: predicated region body
PF: predicated region fallthrough
CT: control target
= control target key end

     0   :  { %9 = vsyncpa [#allocation3], 0  ;;  %s2108_s0 = inlined_call_operand.hbm [shape: bf16[32,256], index: 0, kind: input, shape index: {}]   ;;  %s2109_s1 = inlined_call_operand.hbm [shape: bf16[32,256], index: 1, kind: input, shape index: {}]   ;;  %s2110_s2 = inlined_call_operand.hbm [shape: bf16[256,512], index: 2, kind: input, shape index: {}]   ;;  %s2111_s3 = inlined_call_operand.hbm [shape: bf16[256,128], index: 3, kind: input, shape index: {}]   ;;  %s2112_s4 = inlined_call_operand.hbm [shape: f32[1,1], index: 4, kind: output, shape index: {}]  }
   0x1   :  { %10 = vsyncpa [#allocation6], 0 }
   0x2   :  { %11 = vsyncpa [#allocation9], 0 }
   0x3   :  { %12 = vsyncpa [#allocation4], 0  ;;  %s1625_s15 = smov [#allocation5]   ;;  %s1626_s17 = smov [#allocation2]  }
   0x4   :  { %s30_s16 = sshll.u32 %s1625_s15, 4  ;;  %s18_s18 = sshll.u32 %s1626_s17, 4  ;;  %s31_s16 = int_to_ptr.vmem [resolvable:$true] %s30_s16  ;;  %s1661_s18 = int_to_ptr.vmem [resolvable:$true] %s18_s18 }
   0x5   :  { %s1519_s21 = scalar_lea.hbm %s2109_s1, 512 }
   0x6   :  { %p1520_p0 = scmp.ne.s32.totalorder %s2109_s1, %s1519_s21  ;;  %p1523_p1 = scmp.lt.u32.totalorder %s1519_s21, %s2109_s1 }
   0x8   :  { %p1525_p2 = pnand %p1523_p1, %p1520_p0 }
   0xa   :  { %1528 = shalt.err (!%p1525_p2)
}
   0xb   :  { %s1529_s26 = scalar_lea.vmem %s31_s16, 512  ;;  %p1534_p4 = scmp.lt.s32.totalorder %s31_s16, %s31_s16 }
   0xc   :  { %p1530_p3 = scmp.ne.s32.totalorder %s31_s16, %s1529_s26  ;;  %p1535_p5 = scmp.lt.s32.totalorder %s1529_s26, %s1529_s26 }
   0xe   :  { %p1536_p6 = por %p1535_p5, %p1534_p4 }
  0x10   :  { %p1537_p7 = pnand %p1536_p6, %p1530_p3 }
  0x12   :  { %1540 = shalt.err (!%p1537_p7)
}
  0x13   :  { %s1627_s27 = smov 128   ;;  %s1628_s28 = smov 8  }
  0x14   :  { %36 = dma.hbm_to_vmem [thread:$0]  %s2109_s1, 512, %s31_s16, [#allocation6], %s1627_s27, %s1627_s27, %s1628_s28  }
  0x15   :  { %s1541_s7 = scalar_lea.hbm %s2108_s0, 512 }
  0x16   :  { %p1542_p8 = scmp.ne.s32.totalorder %s2108_s0, %s1541_s7  ;;  %p1545_p9 = scmp.lt.u32.totalorder %s1541_s7, %s2108_s0 }
  0x18   :  { %p1547_p10 = pnand %p1545_p9, %p1542_p8 }
  0x1a   :  { %1550 = shalt.err (!%p1547_p10)
}
  0x1b   :  { %s1551_s12 = scalar_lea.vmem %s1661_s18, 512  ;;  %p1556_p12 = scmp.lt.s32.totalorder %s1661_s18, %s1661_s18 }
  0x1c   :  { %p1552_p11 = scmp.ne.s32.totalorder %s1661_s18, %s1551_s12  ;;  %p1557_p13 = scmp.lt.s32.totalorder %s1551_s12, %s1551_s12 }
  0x1e   :  { %p1558_p0 = por %p1557_p13, %p1556_p12 }
  0x20   :  { %p1559_p1 = pnand %p1558_p0, %p1552_p11 }
  0x22   :  { %1562 = shalt.err (!%p1559_p1)
}
  0x23   :  { %24 = dma.hbm_to_vmem [thread:$0]  %s2108_s0, 512, %s1661_s18, [#allocation3], %s1627_s27, %s1627_s27, %s1628_s28  }
  0x24   :  { %s1629_s14 = smov [#allocation7]   ;;  %s1563_s19 = scalar_lea.hbm %s2110_s2, 8192 }
  0x25   :  { %s42_s15 = sshll.u32 %s1629_s14, 4  ;;  %p1564_p2 = scmp.ne.s32.totalorder %s2110_s2, %s1563_s19  ;;  %s43_s15 = int_to_ptr.vmem [resolvable:$true] %s42_s15 }
  0x26   :  { %p1567_p3 = scmp.lt.u32.totalorder %s1563_s19, %s2110_s2 }
  0x28   :  { %p1569_p4 = pnand %p1567_p3, %p1564_p2 }
  0x2a   :  { %1572 = shalt.err (!%p1569_p4)
}
  0x2b   :  { %s1573_s24 = scalar_lea.vmem %s43_s15, 8192  ;;  %p1578_p6 = scmp.lt.s32.totalorder %s43_s15, %s43_s15 }
  0x2c   :  { %p1574_p5 = scmp.ne.s32.totalorder %s43_s15, %s1573_s24  ;;  %p1579_p7 = scmp.lt.s32.totalorder %s1573_s24, %s1573_s24 }
  0x2e   :  { %p1580_p8 = por %p1579_p7, %p1578_p6 }
  0x30   :  { %p1581_p9 = pnand %p1580_p8, %p1574_p5 }
  0x32   :  { %1584 = shalt.err (!%p1581_p9)
}
  0x33   :  { %s1630_s0 = smov 256   ;;  %s1631_s18 = smov 16  }
  0x34   :  { %48 = dma.hbm_to_vmem [thread:$0]  %s2110_s2, 8192, %s43_s15, [#allocation6], %s1630_s0, %s1630_s0, %s1631_s18  }
  0x35   :  { %s1632_s27 = smov [#allocation8]   ;;  %s1585_s5 = scalar_lea.hbm %s2111_s3, 2048 }
  0x36   :  { %s54_s28 = sshll.u32 %s1632_s27, 4  ;;  %p1586_p10 = scmp.ne.s32.totalorder %s2111_s3, %s1585_s5  ;;  %s55_s28 = int_to_ptr.vmem [resolvable:$true] %s54_s28 }
  0x37   :  { %p1589_p11 = scmp.lt.u32.totalorder %s1585_s5, %s2111_s3 }
  0x39   :  { %p1591_p12 = pnand %p1589_p11, %p1586_p10 }
  0x3b   :  { %1594 = shalt.err (!%p1591_p12)
}
  0x3c   :  { %s1595_s10 = scalar_lea.vmem %s55_s28, 2048  ;;  %p1600_p0 = scmp.lt.s32.totalorder %s55_s28, %s55_s28 }
  0x3d   :  { %p1596_p13 = scmp.ne.s32.totalorder %s55_s28, %s1595_s10  ;;  %p1601_p1 = scmp.lt.s32.totalorder %s1595_s10, %s1595_s10 }
  0x3f   :  { %p1602_p2 = por %p1601_p1, %p1600_p0 }
  0x41   :  { %p1603_p3 = pnand %p1602_p2, %p1596_p13 }
  0x43   :  { %1606 = shalt.err (!%p1603_p3)
}
  0x44   :  { %s1633_s2 = smov 64   ;;  %s1634_s11 = smov 4  }
  0x45   :  { %60 = dma.hbm_to_vmem [thread:$0]  %s2111_s3, 2048, %s55_s28, [#allocation9], %s1633_s2, %s1633_s2, %s1634_s11  }
  0x46   :  { %1617 = dma.done.wait [#allocation3], 512  }
  0x47   :  { %1618 = vsyncadd [#allocation3], 4294966784 }
  0x48   :  { %1619 = dma.done.wait [#allocation6], 8704  }
  0x49   :  { %1620 = vsyncadd [#allocation6], 4294958592 }
  0x4a   :  { %1621 = dma.done.wait [#allocation9], 2048  }
  0x4b   :  { %1622 = vsyncadd [#allocation9], 4294965248  ;;  %v1716_v0 = vld [vmem:[#allocation7 + $0x4] ss:$16 sps:$4 sm:$0xff]   ;;  %v1718_v1 = vld [vmem:[#allocation7 + $0xc] ss:$16 sps:$4 sm:$0xff]  }
  0x4c   :  { %514 = vmatprep.subr.bf16.mxu0 %v1716_v0  ;;  %v1721_v2 = vld [vmem:[#allocation7] ss:$16 sps:$4 sm:$0xff]   ;;  %v1723_v3 = vld [vmem:[#allocation7 + $0x8] ss:$16 sps:$4 sm:$0xff]   ;;  %567 = vmatprep.subr.bf16.mxu1 %v1718_v1  ;;  %v1726_v4 = vld [vmem:[#allocation7 + $0x24] ss:$16 sps:$4 sm:$0xff]  }
  0x4d   :  { %515 = vmatpush1.bf16.msra.mxu0 %v1721_v2  ;;  %568 = vmatpush1.bf16.msra.mxu1 %v1723_v3  ;;  %v1730_v5 = vld [vmem:[#allocation7 + $0x2c] ss:$16 sps:$4 sm:$0xff]   ;;  %v1732_v6 = vld [vmem:[#allocation7 + $0x20] ss:$16 sps:$4 sm:$0xff]   ;;  %v1735_v7 = vld [vmem:[#allocation7 + $0x28] ss:$16 sps:$4 sm:$0xff]  }
  0x4e   :  { %516 = vmatprep.subr.bf16.mxu0 %v1726_v4  ;;  %569 = vmatprep.subr.bf16.mxu1 %v1730_v5  ;;  %v1738_v8 = vld [vmem:[#allocation7 + $0x44] ss:$16 sps:$4 sm:$0xff]   ;;  %v1740_v9 = vld [vmem:[#allocation7 + $0x4c] ss:$16 sps:$4 sm:$0xff]   ;;  %v1742_v10 = vld [vmem:[#allocation7 + $0x40] ss:$16 sps:$4 sm:$0xff]  }
  0x4f   :  { %v1744_v11 = vld [vmem:[#allocation7 + $0x48] ss:$16 sps:$4 sm:$0xff]   ;;  %v1748_v12 = vld [vmem:[#allocation7 + $0x64] ss:$16 sps:$4 sm:$0xff]   ;;  %v1752_v13 = vld [vmem:[#allocation7 + $0x6c] ss:$16 sps:$4 sm:$0xff]  }
  0x50   :  { %v1754_v14 = vld [vmem:[#allocation7 + $0x60] ss:$16 sps:$4 sm:$0xff]   ;;  %v1758_v15 = vld [vmem:[#allocation7 + $0x68] ss:$16 sps:$4 sm:$0xff]   ;;  %v1760_v16 = vld [vmem:[#allocation7 + $0x84] ss:$16 sps:$4 sm:$0xff]  }
  0x51   :  { %517 = vmatpush1.bf16.msra.mxu0 %v1732_v6  ;;  %570 = vmatpush1.bf16.msra.mxu1 %v1735_v7  ;;  %v1764_v17 = vld [vmem:[#allocation7 + $0x8c] ss:$16 sps:$4 sm:$0xff]   ;;  %v1766_v18 = vld [vmem:[#allocation7 + $0x80] ss:$16 sps:$4 sm:$0xff]   ;;  %v1768_v19 = vld [vmem:[#allocation7 + $0x88] ss:$16 sps:$4 sm:$0xff]  }
  0x52   :  { %518 = vmatprep.subr.bf16.mxu0 %v1738_v8  ;;  %571 = vmatprep.subr.bf16.mxu1 %v1740_v9  ;;  %v1772_v20 = vld [vmem:[#allocation7 + $0xa4] ss:$16 sps:$4 sm:$0xff]   ;;  %v1776_v21 = vld [vmem:[#allocation7 + $0xac] ss:$16 sps:$4 sm:$0xff]   ;;  %v1778_v22 = vld [vmem:[#allocation7 + $0xa0] ss:$16 sps:$4 sm:$0xff]  }
  0x53   :  { %v1782_v23 = vld [vmem:[#allocation7 + $0xa8] ss:$16 sps:$4 sm:$0xff]   ;;  %v1784_v24 = vld [vmem:[#allocation7 + $0xc4] ss:$16 sps:$4 sm:$0xff]   ;;  %v1788_v25 = vld [vmem:[#allocation7 + $0xcc] ss:$16 sps:$4 sm:$0xff]  }
  0x54   :  { %v1790_v26 = vld [vmem:[#allocation7 + $0xc0] ss:$16 sps:$4 sm:$0xff]   ;;  %v1792_v27 = vld [vmem:[#allocation7 + $0xc8] ss:$16 sps:$4 sm:$0xff]   ;;  %v1796_v28 = vld [vmem:[#allocation7 + $0xe4] ss:$16 sps:$4 sm:$0xff]  }
  0x55   :  { %519 = vmatpush1.bf16.msra.mxu0 %v1742_v10  ;;  %572 = vmatpush1.bf16.msra.mxu1 %v1744_v11  ;;  %v1800_v29 = vld [vmem:[#allocation7 + $0xec] ss:$16 sps:$4 sm:$0xff]   ;;  %v1802_v30 = vld [vmem:[#allocation7 + $0xe0] ss:$16 sps:$4 sm:$0xff]   ;;  %v1806_v31 = vld [vmem:[#allocation7 + $0xe8] ss:$16 sps:$4 sm:$0xff]  }
  0x56   :  { %520 = vmatprep.subr.bf16.mxu0 %v1748_v12  ;;  %573 = vmatprep.subr.bf16.mxu1 %v1752_v13  ;;  %v1808_v32 = vld [vmem:[#allocation7 + $0x104] ss:$16 sps:$4 sm:$0xff]   ;;  %v1812_v33 = vld [vmem:[#allocation7 + $0x10c] ss:$16 sps:$4 sm:$0xff]   ;;  %v1814_v34 = vld [vmem:[#allocation7 + $0x100] ss:$16 sps:$4 sm:$0xff]  }
  0x57   :  { %v1816_v35 = vld [vmem:[#allocation7 + $0x108] ss:$16 sps:$4 sm:$0xff]   ;;  %v1820_v36 = vld [vmem:[#allocation7 + $0x124] ss:$16 sps:$4 sm:$0xff]   ;;  %v1824_v37 = vld [vmem:[#allocation7 + $0x12c] ss:$16 sps:$4 sm:$0xff]  }
  0x58   :  { %v1826_v38 = vld [vmem:[#allocation7 + $0x120] ss:$16 sps:$4 sm:$0xff]   ;;  %v1830_v39 = vld [vmem:[#allocation7 + $0x128] ss:$16 sps:$4 sm:$0xff]   ;;  %v1832_v40 = vld [vmem:[#allocation7 + $0x144] ss:$16 sps:$4 sm:$0xff]  }
  0x59   :  { %521 = vmatpush1.bf16.msra.mxu0 %v1754_v14  ;;  %574 = vmatpush1.bf16.msra.mxu1 %v1758_v15  ;;  %v1836_v41 = vld [vmem:[#allocation7 + $0x14c] ss:$16 sps:$4 sm:$0xff]   ;;  %v1838_v42 = vld [vmem:[#allocation7 + $0x140] ss:$16 sps:$4 sm:$0xff]   ;;  %v1840_v43 = vld [vmem:[#allocation7 + $0x148] ss:$16 sps:$4 sm:$0xff]  }
  0x5a   :  { %522 = vmatprep.subr.bf16.mxu0 %v1760_v16  ;;  %575 = vmatprep.subr.bf16.mxu1 %v1764_v17  ;;  %v1844_v44 = vld [vmem:[#allocation7 + $0x164] ss:$16 sps:$4 sm:$0xff]   ;;  %v1848_v45 = vld [vmem:[#allocation7 + $0x16c] ss:$16 sps:$4 sm:$0xff]   ;;  %v1850_v46 = vld [vmem:[#allocation7 + $0x160] ss:$16 sps:$4 sm:$0xff]  }
  0x5b   :  { %v1852_v47 = vld [vmem:[#allocation7 + $0x168] ss:$16 sps:$4 sm:$0xff]   ;;  %v1445_v48 = vld [vmem:[#allocation5 + $0x4] ss:$8 sps:$4 sm:$0xff]   ;;  %v1862_v51 = vld [vmem:[#allocation7 + $0x180] ss:$16 sps:$4 sm:$0xff]  }
  0x5c   :  { %v1856_v49 = vld [vmem:[#allocation7 + $0x184] ss:$16 sps:$4 sm:$0xff]   ;;  %v1860_v50 = vld [vmem:[#allocation7 + $0x18c] ss:$16 sps:$4 sm:$0xff]   ;;  %v1864_v52 = vld [vmem:[#allocation7 + $0x188] ss:$16 sps:$4 sm:$0xff]   ;;  %546 = vmatprep.mubr.bf16.mxu0 %v1445_v48  ;;  %599 = vmatprep.mubr.bf16.mxu1 %v1445_v48 }
  0x5d   :  { %523 = vmatpush1.bf16.msra.mxu0 %v1766_v18  ;;  %576 = vmatpush1.bf16.msra.mxu1 %v1768_v19  ;;  %2119 = vst [vmem:[#allocation15_spill] sm:$0xff] %v1860_v50  ;;  %2120 = vst [vmem:[#allocation16_spill] sm:$0xff] %v1864_v52  ;;  %v1866_v53 = vld [vmem:[#allocation7 + $0x1a4] ss:$16 sps:$4 sm:$0xff]   ;;  %v1870_v54 = vld [vmem:[#allocation7 + $0x1ac] ss:$16 sps:$4 sm:$0xff]  }
  0x5e   :  { %524 = vmatprep.subr.bf16.mxu0 %v1772_v20  ;;  %577 = vmatprep.subr.bf16.mxu1 %v1776_v21  ;;  %2121 = vst [vmem:[#allocation17_spill] sm:$0xff] %v1870_v54  ;;  %v1874_v55 = vld [vmem:[#allocation7 + $0x1a0] ss:$16 sps:$4 sm:$0xff]   ;;  %v1876_v56 = vld [vmem:[#allocation7 + $0x1a8] ss:$16 sps:$4 sm:$0xff]   ;;  %s1607_s15 = scalar_lea.hbm %s2112_s4, 16 }
  0x5f   :  { %2122 = vst [vmem:[#allocation18_spill] sm:$0xff] %v1876_v56  ;;  %v1878_v57 = vld [vmem:[#allocation7 + $0x1c4] ss:$16 sps:$4 sm:$0xff]   ;;  %v1880_v58 = vld [vmem:[#allocation7 + $0x1cc] ss:$16 sps:$4 sm:$0xff]   ;;  %p1608_p4 = scmp.ne.s32.totalorder %s2112_s4, %s1607_s15  ;;  %p1611_p5 = scmp.lt.u32.totalorder %s1607_s15, %s2112_s4 }
  0x60   :  { %2123 = vst [vmem:[#allocation19_spill] sm:$0xff] %v1880_v58  ;;  %v1435_v59 = vld [vmem:[#allocation7 + $0x1c0] ss:$16 sps:$4 sm:$0xff]   ;;  %v1886_v60 = vld [vmem:[#allocation7 + $0x1c8] ss:$16 sps:$4 sm:$0xff]  }
  0x61   :  { %525 = vmatpush1.bf16.msra.mxu0 %v1778_v22  ;;  %578 = vmatpush1.bf16.msra.mxu1 %v1782_v23  ;;  %v1437_v61 = vld [vmem:[#allocation7 + $0x1e4] ss:$16 sps:$4 sm:$0xff]   ;;  %v1888_v62 = vld [vmem:[#allocation7 + $0x1ec] ss:$16 sps:$4 sm:$0xff]   ;;  %v1441_v63 = vld [vmem:[#allocation7 + $0x1e0] ss:$16 sps:$4 sm:$0xff]   ;;  %p1613_p6 = pnand %p1611_p5, %p1608_p4 }
  0x62   :  { %526 = vmatprep.subr.bf16.mxu0 %v1784_v24  ;;  %579 = vmatprep.subr.bf16.mxu1 %v1788_v25  ;;  %v1895_v48 = vld [vmem:[#allocation7 + $0x1e8] ss:$16 sps:$4 sm:$0xff]  }
  0x63   :  { %2124 = vst [vmem:[#allocation20_spill] sm:$0xff] %v1895_v48 }
  0x65   :  { %527 = vmatpush1.bf16.msra.mxu0 %v1790_v26  ;;  %580 = vmatpush1.bf16.msra.mxu1 %v1792_v27 }
  0x66   :  { %528 = vmatprep.subr.bf16.mxu0 %v1796_v28  ;;  %581 = vmatprep.subr.bf16.mxu1 %v1800_v29 }
  0x69   :  { %529 = vmatpush1.bf16.msra.mxu0 %v1802_v30  ;;  %582 = vmatpush1.bf16.msra.mxu1 %v1806_v31 }
  0x6a   :  { %530 = vmatprep.subr.bf16.mxu0 %v1808_v32  ;;  %583 = vmatprep.subr.bf16.mxu1 %v1812_v33 }
  0x6d   :  { %531 = vmatpush1.bf16.msra.mxu0 %v1814_v34  ;;  %584 = vmatpush1.bf16.msra.mxu1 %v1816_v35 }
  0x6e   :  { %532 = vmatprep.subr.bf16.mxu0 %v1820_v36  ;;  %585 = vmatprep.subr.bf16.mxu1 %v1824_v37 }
  0x71   :  { %533 = vmatpush1.bf16.msra.mxu0 %v1826_v38  ;;  %586 = vmatpush1.bf16.msra.mxu1 %v1830_v39 }
  0x72   :  { %534 = vmatprep.subr.bf16.mxu0 %v1832_v40  ;;  %587 = vmatprep.subr.bf16.mxu1 %v1836_v41 }
  0x75   :  { %535 = vmatpush1.bf16.msra.mxu0 %v1838_v42  ;;  %588 = vmatpush1.bf16.msra.mxu1 %v1840_v43 }
  0x76   :  { %536 = vmatprep.subr.bf16.mxu0 %v1844_v44  ;;  %589 = vmatprep.subr.bf16.mxu1 %v1848_v45 }
  0x79   :  { %537 = vmatpush1.bf16.msra.mxu0 %v1850_v46  ;;  %590 = vmatpush1.bf16.msra.mxu1 %v1852_v47 }
  0x7a   :  { %538 = vmatprep.subr.bf16.mxu0 %v1856_v49  ;;  %591 = vmatprep.subr.bf16.mxu1 %v1860_v50  ;;  %v1446_v50 = vld [vmem:[#allocation5 + $0x14] ss:$8 sps:$4 sm:$0xff]  }
  0x7d   :  { %539 = vmatpush1.bf16.msra.mxu0 %v1862_v51  ;;  %592 = vmatpush1.bf16.msra.mxu1 %v1864_v52  ;;  %v1443_v52 = vld [vmem:[#allocation5] ss:$8 sps:$4 sm:$0xff]  }
  0x7e   :  { %540 = vmatprep.subr.bf16.mxu0 %v1866_v53  ;;  %593 = vmatprep.subr.bf16.mxu1 %v1870_v54  ;;  %v1449_v54 = vld [vmem:[#allocation8 + $0x40] sm:$0xff]  }
  0x81   :  { %541 = vmatpush1.bf16.msra.mxu0 %v1874_v55  ;;  %594 = vmatpush1.bf16.msra.mxu1 %v1876_v56  ;;  %v1899_v56 = vld [vmem:[#allocation8] sm:$0xff]  }
  0x82   :  { %542 = vmatprep.subr.bf16.mxu0 %v1878_v57  ;;  %595 = vmatprep.subr.bf16.mxu1 %v1880_v58  ;;  %v1902_v58 = vld [vmem:[#allocation8 + $0x48] sm:$0xff]  }
  0x85   :  { %543 = vmatpush1.bf16.msra.mxu0 %v1435_v59  ;;  %596 = vmatpush1.bf16.msra.mxu1 %v1886_v60 }
  0x86   :  { %544 = vmatprep.subr.bf16.mxu0 %v1437_v61  ;;  %597 = vmatprep.subr.bf16.mxu1 %v1888_v62 }
  0x89   :  { %545 = vmatpush1.bf16.msra.mxu0 %v1441_v63  ;;  %598 = vmatpush1.bf16.msra.mxu1 %v1895_v48  ;;  %v1448_v48 = vld [vmem:[#allocation5 + $0x10] ss:$8 sps:$4 sm:$0xff]  }
  0x8a   :  { %1278 = vmatprep.subr.bf16.mxu0 %v1449_v54  ;;  %893 = vmatprep.subr.bf16.mxu1 %v1716_v0  ;;  %v1452_v0 = vld [vmem:[#allocation8 + $0x8] sm:$0xff]  }
  0x8c   :  { %547 = vmatmul.mubr.bf16.vlgmr.msra.gmra.mrb[0].mxu0 %v1443_v52  ;;  %600 = vmatmul.mubr.bf16.vlgmr.msra.gmra.mrb[0].mxu1 %v1443_v52 }
  0x8d   :  { %556 = vmatprep.mubr.bf16.mxu0 %v1446_v50  ;;  %609 = vmatprep.mubr.bf16.mxu1 %v1446_v50 }
  0x8e   :  { %1279 = vmatpush3.bf16.msra.mxu0 %v1899_v56  ;;  %894 = vmatpush1.bf16.msra.mxu1 %v1721_v2  ;;  %v1453_v2 = vld [vmem:[#allocation8 + $0x50] sm:$0xff]  }
  0x8f   :  { %1280 = vmatprep.subr.bf16.mxu0 %v1902_v58  ;;  %895 = vmatprep.subr.bf16.mxu1 %v1726_v4  ;;  %v1454_v4 = vld [vmem:[#allocation8 + $0x10] sm:$0xff]  }
  0x92   :  { %896 = vmatpush1.bf16.msra.mxu1 %v1732_v6  ;;  %1281 = vmatpush3.bf16.msra.mxu0 %v1452_v0  ;;  %v1455_v6 = vld [vmem:[#allocation8 + $0x58] sm:$0xff]  }
  0x93   :  { %897 = vmatprep.subr.bf16.mxu1 %v1738_v8  ;;  %1282 = vmatprep.subr.bf16.mxu0 %v1453_v2  ;;  %v1456_v8 = vld [vmem:[#allocation8 + $0x18] sm:$0xff]  }
  0x94   :  { %557 = vmatmul.mubr.bf16.gmra.mrb[4].mxu0 %v1448_v48  ;;  %610 = vmatmul.mubr.bf16.gmra.mrb[4].mxu1 %v1448_v48 }
  0x96   :  { %898 = vmatpush1.bf16.msra.mxu1 %v1742_v10  ;;  %1283 = vmatpush3.bf16.msra.mxu0 %v1454_v4  ;;  %v1457_v10 = vld [vmem:[#allocation8 + $0x60] sm:$0xff]  }
  0x97   :  { %899 = vmatprep.subr.bf16.mxu1 %v1748_v12  ;;  %1284 = vmatprep.subr.bf16.mxu0 %v1455_v6  ;;  %v1458_v12 = vld [vmem:[#allocation8 + $0x20] sm:$0xff]  }
  0x9a   :  { %900 = vmatpush1.bf16.msra.mxu1 %v1754_v14  ;;  %1285 = vmatpush3.bf16.msra.mxu0 %v1456_v8  ;;  %v1459_v14 = vld [vmem:[#allocation8 + $0x68] sm:$0xff]  }
  0x9b   :  { %901 = vmatprep.subr.bf16.mxu1 %v1760_v16  ;;  %1286 = vmatprep.subr.bf16.mxu0 %v1457_v10  ;;  %v1460_v16 = vld [vmem:[#allocation8 + $0x28] sm:$0xff]  }
  0x9e   :  { %902 = vmatpush1.bf16.msra.mxu1 %v1766_v18  ;;  %1287 = vmatpush3.bf16.msra.mxu0 %v1458_v12  ;;  %v1461_v18 = vld [vmem:[#allocation8 + $0x70] sm:$0xff]  }
  0x9f   :  { %903 = vmatprep.subr.bf16.mxu1 %v1772_v20  ;;  %1288 = vmatprep.subr.bf16.mxu0 %v1459_v14  ;;  %v1462_v20 = vld [vmem:[#allocation8 + $0x30] sm:$0xff]  }
  0xa2   :  { %904 = vmatpush1.bf16.msra.mxu1 %v1778_v22  ;;  %1289 = vmatpush3.bf16.msra.mxu0 %v1460_v16  ;;  %v1463_v22 = vld [vmem:[#allocation8 + $0x78] sm:$0xff]  }
  0xa3   :  { %905 = vmatprep.subr.bf16.mxu1 %v1784_v24  ;;  %1290 = vmatprep.subr.bf16.mxu0 %v1461_v18  ;;  %v1464_v24 = vld [vmem:[#allocation8 + $0x38] sm:$0xff]  }
  0xa6   :  { %906 = vmatpush1.bf16.msra.mxu1 %v1790_v26  ;;  %1291 = vmatpush3.bf16.msra.mxu0 %v1462_v20  ;;  %v1935_v26 = vld [vmem:[#allocation2] ss:$8 sps:$4 sm:$0xff]  }
  0xa7   :  { %907 = vmatprep.subr.bf16.mxu1 %v1796_v28  ;;  %1292 = vmatprep.subr.bf16.mxu0 %v1463_v22  ;;  %v1937_v28 = vld [vmem:[#allocation2 + $0x4] ss:$8 sps:$4 sm:$0xff]  }
  0xa8   :  { %925 = vmatprep.mubr.bf16.mxu1 %v1937_v28 }
  0xaa   :  { %908 = vmatpush1.bf16.msra.mxu1 %v1802_v30  ;;  %1293 = vmatpush3.bf16.msra.mxu0 %v1464_v24  ;;  %v1943_v30 = vld [vmem:[#allocation2 + $0x14] ss:$8 sps:$4 sm:$0xff]  }
  0xab   :  { %909 = vmatprep.subr.bf16.mxu1 %v1808_v32  ;;  %946 = vmatprep.subr.bf16.mxu0 %v1718_v1  ;;  %v1945_v32 = vld [vmem:[#allocation2 + $0x10] ss:$8 sps:$4 sm:$0xff]  }
  0xae   :  { %910 = vmatpush1.bf16.msra.mxu1 %v1814_v34 }
  0xaf   :  { %911 = vmatprep.subr.bf16.mxu1 %v1820_v36 }
  0xb2   :  { %912 = vmatpush1.bf16.msra.mxu1 %v1826_v38 }
  0xb3   :  { %913 = vmatprep.subr.bf16.mxu1 %v1832_v40 }
  0xb6   :  { %914 = vmatpush1.bf16.msra.mxu1 %v1838_v42 }
  0xb7   :  { %915 = vmatprep.subr.bf16.mxu1 %v1844_v44 }
  0xba   :  { %916 = vmatpush1.bf16.msra.mxu1 %v1850_v46 }
  0xbb   :  { %917 = vmatprep.subr.bf16.mxu1 %v1856_v49 }
  0xbe   :  { %918 = vmatpush1.bf16.msra.mxu1 %v1862_v51 }
  0xbf   :  { %919 = vmatprep.subr.bf16.mxu1 %v1866_v53 }
  0xc2   :  { %920 = vmatpush1.bf16.msra.mxu1 %v1874_v55 }
  0xc3   :  { %921 = vmatprep.subr.bf16.mxu1 %v1878_v57 }
  0xc6   :  { %922 = vmatpush1.bf16.msra.mxu1 %v1435_v59 }
  0xc7   :  { %923 = vmatprep.subr.bf16.mxu1 %v1437_v61 }
  0xca   :  { %924 = vmatpush1.bf16.msra.mxu1 %v1441_v63 }
  0xcb   :  { %1306 = vmatprep.subr.bf16.mxu1 %v1449_v54 }
  0xcd   :  { %926 = vmatmul.mubr.bf16.vlgmr.msra.gmra.mrb[8].mxu1 %v1935_v26 }
  0xce   :  { %1307 = vmatpush3.bf16.msra.mxu1 %v1899_v56  ;;  %935 = vmatprep.mubr.bf16.mxu1 %v1943_v30 }
  0xcf   :  { %1308 = vmatprep.subr.bf16.mxu1 %v1902_v58 }
  0xd2   :  { %1309 = vmatpush3.bf16.msra.mxu1 %v1452_v0 }
  0xd3   :  { %1310 = vmatprep.subr.bf16.mxu1 %v1453_v2 }
  0xd5   :  { %936 = vmatmul.mubr.bf16.gmra.mrb[12].mxu1 %v1945_v32 }
  0xd6   :  { %1311 = vmatpush3.bf16.msra.mxu1 %v1454_v4 }
  0xd7   :  { %1312 = vmatprep.subr.bf16.mxu1 %v1455_v6 }
  0xda   :  { %1313 = vmatpush3.bf16.msra.mxu1 %v1456_v8 }
  0xdb   :  { %1314 = vmatprep.subr.bf16.mxu1 %v1457_v10 }
  0xde   :  { %1315 = vmatpush3.bf16.msra.mxu1 %v1458_v12 }
  0xdf   :  { %1316 = vmatprep.subr.bf16.mxu1 %v1459_v14 }
  0xe2   :  { %1317 = vmatpush3.bf16.msra.mxu1 %v1460_v16 }
  0xe3   :  { %1318 = vmatprep.subr.bf16.mxu1 %v1461_v18 }
  0xe6   :  { %1319 = vmatpush3.bf16.msra.mxu1 %v1462_v20 }
  0xe7   :  { %1320 = vmatprep.subr.bf16.mxu1 %v1463_v22 }
  0xea   :  { %1321 = vmatpush3.bf16.msra.mxu1 %v1464_v24 }
 0x15f   :  { %v548_v1 = vpop.f32.mrb[0].mxu0  ;;  %v601_v34 = vpop.f32.mrb[0].mxu1 }
 0x160   :  { %v620_v36 = vmul.f32 %v548_v1, %v548_v1  ;;  %v628_v38 = vmul.f32 %v601_v34, %v601_v34  ;;  %v550_v40 = vpop.f32.mrb[1].mxu0  ;;  %v603_v42 = vpop.f32.mrb[1].mxu1 }
 0x161   :  { %v621_v44 = vmul.f32 %v550_v40, %v550_v40  ;;  %v629_v46 = vmul.f32 %v603_v42, %v603_v42  ;;  %v552_v49 = vpop.f32.mrb[2].mxu0  ;;  %v605_v50 = vpop.f32.mrb[2].mxu1 }
 0x162   :  { %v636_v51 = vadd.f32 %v628_v38, %v620_v36  ;;  %v622_v52 = vmul.f32 %v552_v49, %v552_v49  ;;  %v630_v53 = vmul.f32 %v605_v50, %v605_v50  ;;  %v554_v54 = vpop.f32.mrb[3].mxu0  ;;  %v607_v55 = vpop.f32.mrb[3].mxu1 }
 0x163   :  { %v637_v56 = vadd.f32 %v629_v46, %v621_v44  ;;  %v623_v57 = vmul.f32 %v554_v54, %v554_v54  ;;  %v631_v58 = vmul.f32 %v607_v55, %v607_v55 }
 0x164   :  { %v1949_v59 = vadd.f32 1e-09, %v636_v51  ;;  %v638_v61 = vadd.f32 %v630_v53, %v622_v52 }
 0x165   :  { %v1951_v63 = vadd.f32 1e-09, %v637_v56  ;;  %v639_v48 = vadd.f32 %v631_v58, %v623_v57 }
 0x166   :  { %1471 = vrsqrt.f32 %v1949_v59  ;;  %v646_v0 = vadd.f32 1e-09, %v638_v61  ;;  %vm654_vm0 = vcmp.eq.f32.partialorder %v1949_v59, inf  ;;  %vm656_vm2 = vcmp.eq.f32.partialorder %v1949_v59, 0.0 }
 0x167   :  { %1473 = vrsqrt.f32 %v1951_v63  ;;  %v647_v2 = vadd.f32 1e-09, %v639_v48  ;;  %v558_v4 = vpop.f32.mrb[4].mxu0  ;;  %v611_v6 = vpop.f32.mrb[4].mxu1  ;;  %vm661_vm1 = vcmp.eq.f32.partialorder %v1951_v63, inf  ;;  %vm663_vm3 = vcmp.eq.f32.partialorder %v1951_v63, 0.0 }
 0x168   :  { %1475 = vrsqrt.f32 %v646_v0  ;;  %v560_v8 = vpop.f32.mrb[5].mxu0  ;;  %v613_v10 = vpop.f32.mrb[5].mxu1  ;;  %v624_v16 = vmul.f32 %v558_v4, %v558_v4  ;;  %v632_v18 = vmul.f32 %v611_v6, %v611_v6  ;;  %v664_v61 = vand.u32 2147483648, %v1951_v63 }
 0x169   :  { %1477 = vrsqrt.f32 %v647_v2  ;;  %v562_v12 = vpop.f32.mrb[6].mxu0  ;;  %v615_v14 = vpop.f32.mrb[6].mxu1  ;;  %v625_v24 = vmul.f32 %v560_v8, %v560_v8  ;;  %v633_v1 = vmul.f32 %v613_v10, %v613_v10  ;;  %v657_v6 = vand.u32 2147483648, %v1949_v59 }
 0x16a   :  { %v564_v20 = vpop.f32.mrb[7].mxu0  ;;  %v617_v22 = vpop.f32.mrb[7].mxu1  ;;  %v626_v34 = vmul.f32 %v562_v12, %v562_v12  ;;  %v634_v36 = vmul.f32 %v615_v14, %v615_v14  ;;  %v640_v38 = vadd.f32 %v632_v18, %v624_v16  ;;  %vm668_vm4 = vcmp.eq.f32.partialorder %v646_v0, inf }
 0x16b   :  { %v627_v40 = vmul.f32 %v564_v20, %v564_v20  ;;  %v635_v42 = vmul.f32 %v617_v22, %v617_v22  ;;  %v641_v44 = vadd.f32 %v633_v1, %v625_v24  ;;  %v671_v14 = vand.u32 2147483648, %v646_v0 }
 0x16c   :  { %v642_v46 = vadd.f32 %v634_v36, %v626_v34  ;;  %v1955_v49 = vadd.f32 1e-09, %v640_v38  ;;  %vm675_vm5 = vcmp.eq.f32.partialorder %v647_v2, inf  ;;  %v678_v16 = vand.u32 2147483648, %v647_v2 }
 0x16d   :  { %v643_v50 = vadd.f32 %v635_v42, %v627_v40  ;;  %v1957_v51 = vadd.f32 1e-09, %v641_v44  ;;  %vm670_vm6 = vcmp.eq.f32.partialorder %v646_v0, 0.0  ;;  %vm677_vm7 = vcmp.eq.f32.partialorder %v647_v2, 0.0 }
 0x16e   :  { %v1959_v52 = vadd.f32 1e-09, %v642_v46  ;;  %1479 = vrsqrt.f32 %v1955_v49  ;;  %vm682_vm8 = vcmp.eq.f32.partialorder %v1955_v49, inf  ;;  %vm684_vm9 = vcmp.eq.f32.partialorder %v1955_v49, 0.0 }
 0x16f   :  { %v1963_v54 = vadd.f32 1e-09, %v643_v50  ;;  %1481 = vrsqrt.f32 %v1957_v51  ;;  %vm689_vm10 = vcmp.eq.f32.partialorder %v1957_v51, inf  ;;  %vm691_vm11 = vcmp.eq.f32.partialorder %v1957_v51, 0.0 }
 0x170   :  { %v1472_v53 = vpop.eup %1471  ;;  %1483 = vrsqrt.f32 %v1959_v52  ;;  %vm696_vm13 = vcmp.eq.f32.partialorder %v1959_v52, inf  ;;  %v699_v46 = vand.u32 2147483648, %v1959_v52  ;;  %vm698_vm14 = vcmp.eq.f32.partialorder %v1959_v52, 0.0 }
 0x171   :  { %v1474_v55 = vpop.eup %1473  ;;  %v653_v56 = vmul.f32 %v1472_v53, %v1949_v59  ;;  %1485 = vrsqrt.f32 %v1963_v54  ;;  %vm703_vm12 = vcmp.eq.f32.partialorder %v1963_v54, inf  ;;  %v706_v53 = vand.u32 2147483648, %v1963_v54 }
 0x172   :  { %v1476_v57 = vpop.eup %1475  ;;  %v660_v58 = vmul.f32 %v1474_v55, %v1951_v63  ;;  %vm705_vm15 = vcmp.eq.f32.partialorder %v1963_v54, 0.0 }
 0x173   :  { %v1478_v48 = vpop.eup %1477  ;;  %v655_v4 = vsel %vm654_vm0, %v1949_v59, %v653_v56  ;;  %v667_v8 = vmul.f32 %v1476_v57, %v646_v0  ;;  %v692_v59 = vand.u32 2147483648, %v1957_v51 }
 0x174   :  { %v662_v10 = vsel %vm661_vm1, %v1951_v63, %v660_v58  ;;  %v674_v12 = vmul.f32 %v1478_v48, %v647_v2  ;;  %v658_v22 = vsel %vm656_vm2, %v657_v6, %v655_v4 }
 0x175   :  { %v669_v18 = vsel %vm668_vm4, %v646_v0, %v667_v8  ;;  %v665_v1 = vsel %vm663_vm3, %v664_v61, %v662_v10  ;;  %v685_v0 = vand.u32 2147483648, %v1955_v49 }
 0x176   :  { %v676_v20 = vsel %vm675_vm5, %v647_v2, %v674_v12  ;;  %v672_v24 = vsel %vm670_vm6, %v671_v14, %v669_v18 }
 0x177   :  { %v679_v34 = vsel %vm677_vm7, %v678_v16, %v676_v20  ;;  %v708_v36 = vpack.c.bf16 %v672_v24, %v658_v22 }
 0x178   :  { %v709_v38 = vpack.c.bf16 %v679_v34, %v665_v1  ;;  %v1480_v40 = vpop.eup %1479 }
 0x179   :  { %v1482_v42 = vpop.eup %1481  ;;  %v681_v63 = vmul.f32 %v1480_v40, %v1955_v49 }
 0x17a   :  { %840 = vmatprep.mubr.bf16.mxu0 %v709_v38  ;;  %v1484_v2 = vpop.eup %1483  ;;  %v688_v44 = vmul.f32 %v1482_v42, %v1957_v51 }
 0x17b   :  { %841 = vmatmul.mubr.bf16.vlgmr.msra.gmra.mrb[8].mxu0 %v708_v36  ;;  %v1486_v50 = vpop.eup %1485  ;;  %v683_v55 = vsel %vm682_vm8, %v1955_v49, %v681_v63  ;;  %v695_v56 = vmul.f32 %v1484_v2, %v1959_v52 }
 0x17c   :  { %947 = vmatpush1.bf16.msra.mxu0 %v1723_v3  ;;  %v690_v3 = vsel %vm689_vm10, %v1957_v51, %v688_v44  ;;  %v702_v57 = vmul.f32 %v1486_v50, %v1963_v54 }
 0x17d   :  { %948 = vmatprep.subr.bf16.mxu0 %v1730_v5  ;;  %v686_v5 = vsel %vm684_vm9, %v685_v0, %v683_v55  ;;  %v693_v58 = vsel %vm691_vm11, %v692_v59, %v690_v3  ;;  %v697_v61 = vsel %vm696_vm13, %v1959_v52, %v695_v56 }
 0x17e   :  { %v704_v48 = vsel %vm703_vm12, %v1963_v54, %v702_v57  ;;  %v700_v4 = vsel %vm698_vm14, %v699_v46, %v697_v61 }
 0x17f   :  { %v707_v6 = vsel %vm705_vm15, %v706_v53, %v704_v48  ;;  %v710_v8 = vpack.c.bf16 %v700_v4, %v686_v5 }
 0x180   :  { %949 = vmatpush1.bf16.msra.mxu0 %v1735_v7  ;;  %v711_v10 = vpack.c.bf16 %v707_v6, %v693_v58  ;;  %v2125_v7 = vld [vmem:[#allocation15_spill] sm:$0xff] }
 0x181   :  { %950 = vmatprep.subr.bf16.mxu0 %v1740_v9  ;;  %v2126_v9 = vld [vmem:[#allocation16_spill] sm:$0xff] }
 0x182   :  { %848 = vmatprep.mubr.bf16.mxu0 %v711_v10 }
 0x183   :  { %849 = vmatmul.mubr.bf16.gmra.mrb[12].mxu0 %v710_v8 }
 0x184   :  { %951 = vmatpush1.bf16.msra.mxu0 %v1744_v11  ;;  %978 = vmatprep.mubr.bf16.mxu0 %v1937_v28  ;;  %v2127_v11 = vld [vmem:[#allocation17_spill] sm:$0xff] }
 0x185   :  { %952 = vmatprep.subr.bf16.mxu0 %v1752_v13  ;;  %v2128_v13 = vld [vmem:[#allocation18_spill] sm:$0xff] }
 0x188   :  { %953 = vmatpush1.bf16.msra.mxu0 %v1758_v15  ;;  %v2129_v15 = vld [vmem:[#allocation19_spill] sm:$0xff] }
 0x189   :  { %954 = vmatprep.subr.bf16.mxu0 %v1764_v17  ;;  %v2130_v17 = vld [vmem:[#allocation20_spill] sm:$0xff] }
 0x18c   :  { %955 = vmatpush1.bf16.msra.mxu0 %v1768_v19 }
 0x18d   :  { %956 = vmatprep.subr.bf16.mxu0 %v1776_v21 }
 0x190   :  { %957 = vmatpush1.bf16.msra.mxu0 %v1782_v23 }
 0x191   :  { %958 = vmatprep.subr.bf16.mxu0 %v1788_v25 }
 0x194   :  { %959 = vmatpush1.bf16.msra.mxu0 %v1792_v27 }
 0x195   :  { %960 = vmatprep.subr.bf16.mxu0 %v1800_v29 }
 0x198   :  { %961 = vmatpush1.bf16.msra.mxu0 %v1806_v31 }
 0x199   :  { %962 = vmatprep.subr.bf16.mxu0 %v1812_v33 }
 0x19c   :  { %963 = vmatpush1.bf16.msra.mxu0 %v1816_v35 }
 0x19d   :  { %964 = vmatprep.subr.bf16.mxu0 %v1824_v37 }
 0x1a0   :  { %965 = vmatpush1.bf16.msra.mxu0 %v1830_v39  ;;  %v927_v19 = vpop.f32.mrb[8].mxu1 }
 0x1a1   :  { %966 = vmatprep.subr.bf16.mxu0 %v1836_v41  ;;  %v929_v21 = vpop.f32.mrb[9].mxu1 }
 0x1a2   :  { %v931_v23 = vpop.f32.mrb[10].mxu1  ;;  %v1000_v49 = vmul.f32 %v929_v21, %v929_v21 }
 0x1a3   :  { %v933_v25 = vpop.f32.mrb[11].mxu1  ;;  %v1001_v16 = vmul.f32 %v931_v23, %v931_v23 }
 0x1a4   :  { %967 = vmatpush1.bf16.msra.mxu0 %v1840_v43  ;;  %v1002_v24 = vmul.f32 %v933_v25, %v933_v25 }
 0x1a5   :  { %968 = vmatprep.subr.bf16.mxu0 %v1848_v45 }
 0x1a8   :  { %969 = vmatpush1.bf16.msra.mxu0 %v1852_v47  ;;  %v937_v27 = vpop.f32.mrb[12].mxu1 }
 0x1a9   :  { %970 = vmatprep.subr.bf16.mxu0 %v2125_v7  ;;  %v939_v29 = vpop.f32.mrb[13].mxu1  ;;  %v1003_v59 = vmul.f32 %v937_v27, %v937_v27 }
 0x1aa   :  { %v941_v31 = vpop.f32.mrb[14].mxu1  ;;  %v1004_v2 = vmul.f32 %v939_v29, %v939_v29 }
 0x1ab   :  { %v943_v33 = vpop.f32.mrb[15].mxu1  ;;  %v1005_v56 = vmul.f32 %v941_v31, %v941_v31 }
 0x1ac   :  { %971 = vmatpush1.bf16.msra.mxu0 %v2126_v9  ;;  %v1006_v58 = vmul.f32 %v943_v33, %v943_v33 }
 0x1ad   :  { %972 = vmatprep.subr.bf16.mxu0 %v2127_v11 }
 0x1b0   :  { %973 = vmatpush1.bf16.msra.mxu0 %v2128_v13 }
 0x1b1   :  { %974 = vmatprep.subr.bf16.mxu0 %v2129_v15 }
 0x1b4   :  { %975 = vmatpush1.bf16.msra.mxu0 %v1886_v60 }
 0x1b5   :  { %976 = vmatprep.subr.bf16.mxu0 %v1888_v62 }
 0x1b8   :  { %977 = vmatpush1.bf16.msra.mxu0 %v2130_v17 }
 0x1bb   :  { %979 = vmatmul.mubr.bf16.vlgmr.msra.gmra.mrb[16].mxu0 %v1935_v26 }
 0x1bc   :  { %988 = vmatprep.mubr.bf16.mxu0 %v1943_v30 }
 0x1c3   :  { %989 = vmatmul.mubr.bf16.gmra.mrb[20].mxu0 %v1945_v32  ;;  %v999_v32 = vmul.f32 %v927_v19, %v927_v19 }
 0x24e   :  { %v1294_v35 = vpop.f32.mrb[8].mxu0 }
 0x24f   :  { %v1295_v37 = vpop.f32.mrb[9].mxu0 }
 0x250   :  { %v2046_v39 = vadd.f32 %v1295_v37, %v1294_v35  ;;  %v1297_v41 = vpop.f32.mrb[10].mxu0 }
 0x251   :  { %v1298_v43 = vpop.f32.mrb[11].mxu0 }
 0x252   :  { %v2048_v45 = vadd.f32 %v1298_v43, %v1297_v41 }
 0x256   :  { %v1300_v47 = vpop.f32.mrb[12].mxu0 }
 0x257   :  { %v1301_v60 = vpop.f32.mrb[13].mxu0 }
 0x258   :  { %v2050_v62 = vadd.f32 %v1301_v60, %v1300_v47  ;;  %v1303_v26 = vpop.f32.mrb[14].mxu0 }
 0x259   :  { %v1304_v28 = vpop.f32.mrb[15].mxu0 }
 0x25a   :  { %v2052_v30 = vadd.f32 %v1304_v28, %v1303_v26 }
 0x28e   :  { %v980_v51 = vpop.f32.mrb[16].mxu0 }
 0x28f   :  { %v1007_v52 = vmul.f32 %v980_v51, %v980_v51  ;;  %v982_v54 = vpop.f32.mrb[17].mxu0 }
 0x290   :  { %v1008_v12 = vmul.f32 %v982_v54, %v982_v54  ;;  %v984_v14 = vpop.f32.mrb[18].mxu0 }
 0x291   :  { %v1015_v18 = vadd.f32 %v1007_v52, %v999_v32  ;;  %v1009_v20 = vmul.f32 %v984_v14, %v984_v14  ;;  %v986_v22 = vpop.f32.mrb[19].mxu0 }
 0x292   :  { %v1016_v1 = vadd.f32 %v1008_v12, %v1000_v49  ;;  %v1010_v34 = vmul.f32 %v986_v22, %v986_v22 }
 0x293   :  { %v1023_v36 = vadd.f32 1e-09, %v1015_v18  ;;  %v1017_v38 = vadd.f32 %v1009_v20, %v1001_v16 }
 0x294   :  { %v1024_v40 = vadd.f32 1e-09, %v1016_v1  ;;  %v1018_v0 = vadd.f32 %v1010_v34, %v1002_v24 }
 0x295   :  { %1487 = vrsqrt.f32 %v1023_v36  ;;  %v1025_v42 = vadd.f32 1e-09, %v1017_v38  ;;  %vm1033_vm0 = vcmp.eq.f32.partialorder %v1023_v36, inf  ;;  %vm1035_vm3 = vcmp.eq.f32.partialorder %v1023_v36, 0.0 }
 0x296   :  { %1489 = vrsqrt.f32 %v1024_v40  ;;  %v1026_v63 = vadd.f32 1e-09, %v1018_v0  ;;  %v990_v44 = vpop.f32.mrb[20].mxu0  ;;  %vm1040_vm1 = vcmp.eq.f32.partialorder %v1024_v40, inf  ;;  %vm1042_vm2 = vcmp.eq.f32.partialorder %v1024_v40, 0.0 }
 0x297   :  { %1491 = vrsqrt.f32 %v1025_v42  ;;  %v1011_v46 = vmul.f32 %v990_v44, %v990_v44  ;;  %v992_v50 = vpop.f32.mrb[21].mxu0  ;;  %v1043_v23 = vand.u32 2147483648, %v1024_v40  ;;  %v1036_v27 = vand.u32 2147483648, %v1023_v36 }
 0x298   :  { %1493 = vrsqrt.f32 %v1026_v63  ;;  %v1012_v53 = vmul.f32 %v992_v50, %v992_v50  ;;  %v994_v55 = vpop.f32.mrb[22].mxu0  ;;  %vm1047_vm4 = vcmp.eq.f32.partialorder %v1025_v42, inf  ;;  %v1050_v35 = vand.u32 2147483648, %v1025_v42 }
 0x299   :  { %v1019_v3 = vadd.f32 %v1011_v46, %v1003_v59  ;;  %v1013_v57 = vmul.f32 %v994_v55, %v994_v55  ;;  %v996_v5 = vpop.f32.mrb[23].mxu0  ;;  %vm1054_vm5 = vcmp.eq.f32.partialorder %v1026_v63, inf  ;;  %v1057_v37 = vand.u32 2147483648, %v1026_v63 }
 0x29a   :  { %v1020_v61 = vadd.f32 %v1012_v53, %v1004_v2  ;;  %v1014_v48 = vmul.f32 %v996_v5, %v996_v5  ;;  %vm1049_vm6 = vcmp.eq.f32.partialorder %v1025_v42, 0.0  ;;  %vm1056_vm7 = vcmp.eq.f32.partialorder %v1026_v63, 0.0 }
 0x29b   :  { %v2054_v4 = vadd.f32 1e-09, %v1019_v3  ;;  %v1021_v6 = vadd.f32 %v1013_v57, %v1005_v56  ;;  %v857_v50 = vmax.f32 %v2046_v39, 1e-05  ;;  %v858_v55 = vmax.f32 %v2048_v45, 1e-05 }
 0x29c   :  { %v2056_v8 = vadd.f32 1e-09, %v1020_v61  ;;  %v1022_v10 = vadd.f32 %v1014_v48, %v1006_v58 }
 0x29d   :  { %1495 = vrsqrt.f32 %v2054_v4  ;;  %v2059_v7 = vadd.f32 1e-09, %v1021_v6  ;;  %vm1061_vm8 = vcmp.eq.f32.partialorder %v2054_v4, inf  ;;  %vm1063_vm11 = vcmp.eq.f32.partialorder %v2054_v4, 0.0 }
 0x29e   :  { %1497 = vrsqrt.f32 %v2056_v8  ;;  %v2062_v9 = vadd.f32 1e-09, %v1022_v10  ;;  %vm1068_vm9 = vcmp.eq.f32.partialorder %v2056_v8, inf  ;;  %vm1070_vm10 = vcmp.eq.f32.partialorder %v2056_v8, 0.0 }
 0x29f   :  { %v1488_v11 = vpop.eup %1487  ;;  %1499 = vrsqrt.f32 %v2059_v7  ;;  %v1071_v18 = vand.u32 2147483648, %v2056_v8  ;;  %v1064_v22 = vand.u32 2147483648, %v2054_v4  ;;  %vm1075_vm12 = vcmp.eq.f32.partialorder %v2059_v7, inf }
 0x2a0   :  { %v1490_v13 = vpop.eup %1489  ;;  %1501 = vrsqrt.f32 %v2062_v9  ;;  %v1032_v15 = vmul.f32 %v1488_v11, %v1023_v36  ;;  %vm1082_vm13 = vcmp.eq.f32.partialorder %v2062_v9, inf  ;;  %v1085_v38 = vand.u32 2147483648, %v2062_v9 }
 0x2a1   :  { %v1492_v17 = vpop.eup %1491  ;;  %v1039_v19 = vmul.f32 %v1490_v13, %v1024_v40  ;;  %vm1077_vm14 = vcmp.eq.f32.partialorder %v2059_v7, 0.0  ;;  %vm1084_vm15 = vcmp.eq.f32.partialorder %v2062_v9, 0.0  ;;  %1503 = vlog2.f32 %v857_v50 }
 0x2a2   :  { %v1494_v21 = vpop.eup %1493  ;;  %v1034_v25 = vsel %vm1033_vm0, %v1023_v36, %v1032_v15  ;;  %v1046_v29 = vmul.f32 %v1492_v17, %v1025_v42  ;;  %v1078_v36 = vand.u32 2147483648, %v2059_v7  ;;  %1505 = vlog2.f32 %v858_v55 }
 0x2a3   :  { %v1041_v31 = vsel %vm1040_vm1, %v1024_v40, %v1039_v19  ;;  %v1053_v33 = vmul.f32 %v1494_v21, %v1026_v63  ;;  %v1037_v47 = vsel %vm1035_vm3, %v1036_v27, %v1034_v25 }
 0x2a4   :  { %v1048_v41 = vsel %vm1047_vm4, %v1025_v42, %v1046_v29  ;;  %v1044_v26 = vsel %vm1042_vm2, %v1043_v23, %v1041_v31 }
 0x2a5   :  { %v1055_v43 = vsel %vm1054_vm5, %v1026_v63, %v1053_v33  ;;  %v1051_v60 = vsel %vm1049_vm6, %v1050_v35, %v1048_v41 }
 0x2a6   :  { %v1058_v28 = vsel %vm1056_vm7, %v1057_v37, %v1055_v43  ;;  %v1087_v32 = vpack.c.bf16 %v1051_v60, %v1037_v47 }
 0x2a7   :  { %v1496_v49 = vpop.eup %1495  ;;  %v1088_v51 = vpack.c.bf16 %v1058_v28, %v1044_v26 }
 0x2a8   :  { %v1498_v52 = vpop.eup %1497  ;;  %v1060_v54 = vmul.f32 %v1496_v49, %v2054_v4 }
 0x2a9   :  { %v1500_v12 = vpop.eup %1499  ;;  %1123 = vmatprep.mubr.bf16.mxu1 %v1088_v51  ;;  %v1067_v14 = vmul.f32 %v1498_v52, %v2056_v8 }
 0x2aa   :  { %v1502_v16 = vpop.eup %1501  ;;  %1124 = vmatmul.mubr.bf16.vlgmr.msra.gmra.mrb[16].mxu1 %v1087_v32  ;;  %v1062_v20 = vsel %vm1061_vm8, %v2054_v4, %v1060_v54  ;;  %v1074_v24 = vmul.f32 %v1500_v12, %v2059_v7  ;;  %v859_v4 = vmax.f32 %v2050_v62, 1e-05 }
 0x2ab   :  { %v1069_v1 = vsel %vm1068_vm9, %v2056_v8, %v1067_v14  ;;  %v1081_v34 = vmul.f32 %v1502_v16, %v2062_v9  ;;  %v1065_v42 = vsel %vm1063_vm11, %v1064_v22, %v1062_v20  ;;  %v860_v8 = vmax.f32 %v2052_v30, 1e-05  ;;  %v1504_v13 = vpop.eup %1503 }
 0x2ac   :  { %v1076_v40 = vsel %vm1075_vm12, %v2059_v7, %v1074_v24  ;;  %v1072_v63 = vsel %vm1070_vm10, %v1071_v18, %v1069_v1  ;;  %v1506_v17 = vpop.eup %1505  ;;  %v862_v21 = vmul.f32 0.6931472, %v1504_v13 }
 0x2ad   :  { %v1083_v0 = vsel %vm1082_vm13, %v2062_v9, %v1081_v34  ;;  %v1079_v59 = vsel %vm1077_vm14, %v1078_v36, %v1076_v40  ;;  %v864_v25 = vmul.f32 0.6931472, %v1506_v17 }
 0x2ae   :  { %v1086_v2 = vsel %vm1084_vm15, %v1085_v38, %v1083_v0  ;;  %v1089_v44 = vpack.c.bf16 %v1079_v59, %v1065_v42 }
 0x2af   :  { %v1090_v46 = vpack.c.bf16 %v1086_v2, %v1072_v63 }
 0x2b1   :  { %1131 = vmatprep.mubr.bf16.mxu1 %v1090_v46 }
 0x2b2   :  { %1132 = vmatmul.mubr.bf16.gmra.mrb[20].mxu1 %v1089_v44 }
 0x37d   :  { %v1322_v53 = vpop.f32.mrb[16].mxu1 }
 0x37e   :  { %v1323_v56 = vpop.f32.mrb[17].mxu1 }
 0x37f   :  { %v1324_v3 = vadd.f32 %v1323_v56, %v1322_v53  ;;  %v1325_v57 = vpop.f32.mrb[18].mxu1 }
 0x380   :  { %v1326_v5 = vpop.f32.mrb[19].mxu1 }
 0x381   :  { %v1140_v58 = vmax.f32 %v1324_v3, 1e-05  ;;  %v1327_v61 = vadd.f32 %v1326_v5, %v1325_v57 }
 0x383   :  { %1507 = vlog2.f32 %v1140_v58  ;;  %v1141_v48 = vmax.f32 %v1327_v61, 1e-05 }
 0x385   :  { %1509 = vlog2.f32 %v1141_v48  ;;  %v1328_v6 = vpop.f32.mrb[20].mxu1 }
 0x386   :  { %v1329_v39 = vpop.f32.mrb[21].mxu1  ;;  %1511 = vlog2.f32 %v859_v4 }
 0x387   :  { %v1330_v10 = vadd.f32 %v1329_v39, %v1328_v6  ;;  %v1331_v7 = vpop.f32.mrb[22].mxu1  ;;  %1513 = vlog2.f32 %v860_v8 }
 0x388   :  { %v1332_v45 = vpop.f32.mrb[23].mxu1 }
 0x389   :  { %v1142_v9 = vmax.f32 %v1330_v10, 1e-05  ;;  %v1333_v11 = vadd.f32 %v1332_v45, %v1331_v7 }
 0x38b   :  { %1515 = vlog2.f32 %v1142_v9  ;;  %v1143_v15 = vmax.f32 %v1333_v11, 1e-05 }
 0x38d   :  { %v1508_v19 = vpop.eup %1507  ;;  %1517 = vlog2.f32 %v1143_v15 }
 0x38e   :  { %v1145_v62 = vmul.f32 0.6931472, %v1508_v19 }
 0x38f   :  { %v1510_v23 = vpop.eup %1509 }
 0x390   :  { %v1152_v27 = vsub.f32 %v862_v21, %v1145_v62  ;;  %v1147_v30 = vmul.f32 0.6931472, %v1510_v23  ;;  %v1512_v31 = vpop.eup %1511 }
 0x391   :  { %v1514_v33 = vpop.eup %1513  ;;  %v866_v43 = vmul.f32 0.6931472, %v1512_v31 }
 0x392   :  { %v1153_v29 = vsub.f32 %v864_v25, %v1147_v30  ;;  %v1156_v35 = vand.u32 2147483647, %v1152_v27  ;;  %v868_v28 = vmul.f32 0.6931472, %v1514_v33 }
 0x394   :  { %v1157_v37 = vand.u32 2147483647, %v1153_v29 }
 0x395   :  { %v1516_v41 = vpop.eup %1515 }
 0x396   :  { %v1149_v47 = vmul.f32 0.6931472, %v1516_v41  ;;  %v1160_v60 = vadd.f32 %v1157_v37, %v1156_v35 }
 0x397   :  { %v1518_v26 = vpop.eup %1517 }
 0x398   :  { %v1151_v32 = vmul.f32 0.6931472, %v1518_v26  ;;  %v1154_v49 = vsub.f32 %v866_v43, %v1149_v47 }
 0x39a   :  { %v1155_v51 = vsub.f32 %v868_v28, %v1151_v32  ;;  %v1158_v52 = vand.u32 2147483647, %v1154_v49 }
 0x39c   :  { %v1159_v54 = vand.u32 2147483647, %v1155_v51  ;;  %v1161_v12 = vadd.f32 %v1160_v60, %v1158_v52 }
 0x39e   :  { %v1162_v14 = vadd.f32 %v1161_v12, %v1159_v54 }
 0x3a0   :  { %1163 = vadd.xlane.f32.xlu0 %v1162_v14 }
 0x42d   :  { %v1164_v16 = vpop.xlane.xlu0 %1163 }
 0x42e   :  { %v1165_v18 = vrot.slane %v1164_v16, 4 }
 0x430   :  { %v1166_v20 = vadd.f32 %v1165_v18, %v1164_v16 }
 0x432   :  { %v1167_v22 = vrot.slane %v1166_v20, 2 }
 0x434   :  { %v1168_v24 = vadd.f32 %v1167_v22, %v1166_v20 }
 0x436   :  { %v1169_v1 = vrot.slane %v1168_v24, 1 }
 0x438   :  { %v1170_v34 = vadd.f32 %v1169_v1, %v1168_v24 }
 0x43a   :  { %1334 = vpush %v1170_v34 }
 0x46b   :  { %s1335_s3 = spop %1334 }
 0x46c   :  { %1173 = sst [smem:[#allocation10]] %s1335_s3 }
 0x46d   :  { %1616 = shalt.err (!%p1613_p6)
}
 0x46e   :  { %s1635_s21 = smov [#allocation10]  }
 0x46f   :  { %1181 = dma.smem_to_hbm %s1635_s21, 16, %s2112_s4, [#allocation4]  }
 0x470   :  { %1623 = dma.done.wait [#allocation4], 16  }
 0x471   :  { %1624 = vsyncadd [#allocation4], 4294967280 }
 0x472   :  { %1185 = sfence }
 0x473   :  { %1186 = vsyncpa [#allocation3], 1 }
 0x474   :  { %1187 = vsyncpa [#allocation6], 1 }
 0x475   :  { %1188 = vsyncpa [#allocation9], 1 }
 0x476   :  { %1189 = vsyncpa [#allocation4], 1 }

</bundles_post_ra>
